<compile_context>
chip_gen: v7x
topology: tpu7x:2x2x1
jax: 0.10.0
libtpu: 0.0.40
codegen_flags: <defaults>
</compile_context>

<pallas_src>
import functools

import jax
import jax.numpy as jnp
from jax.experimental import pallas as pl
from jax.experimental.pallas import tpu as pltpu

LANE = 128


def _round_up(x, m):
    return ((x + m - 1) // m) * m


def _pad2d(a, rows, cols):
    return jnp.pad(a, ((0, rows - a.shape[0]), (0, cols - a.shape[1])))


# --------------------------------------------------------------------------
# Generation-aware VMEM budget and tile selection
# --------------------------------------------------------------------------
def _vmem_capacity_bytes():
    try:
        cap = int(pltpu.get_tpu_info().vmem_capacity_bytes)
        if cap > 0:
            return cap
    except Exception:
        pass
    return 64 * 1024 * 1024  # conservative default (v7x per-TC VMEM)


def _choose_tiles(n, f_pad, out_bytes):
    """Pick (tm, tk, vmem_limit_bytes) for the K-tiled aggregation kernel."""
    cap = _vmem_capacity_bytes()
    budget = int(0.7 * cap)
    n128 = _round_up(max(n, 1), LANE)
    tm_cands = [t for t in (1024, 512, 256, 128) if t <= n128] or [128]
    tk_cands = [t for t in (2048, 1024, 512, 256, 128) if t <= n128] or [128]

    def footprint(tm, tk):
        a_bytes = 2 * tm * tk * 2            # bf16 Â tile, double buffered
        xw_bytes = 2 * tk * f_pad * 2        # bf16 XW tile, double buffered
        b_bytes = 2 * f_pad * 4              # bias (tiny)
        o_bytes = 2 * tm * f_pad * out_bytes  # output tile, double buffered
        acc_bytes = tm * f_pad * 4           # accumulator scratch
        tmp_bytes = tm * f_pad * 4           # f32 dot temporary before +=
        return a_bytes + xw_bytes + b_bytes + o_bytes + acc_bytes + tmp_bytes

    tm_sel, tk_sel = 128, 128  # guaranteed-fit fallback (~0.8 MiB)
    for tm in tm_cands:
        done = False
        for tk in tk_cands:
            if footprint(tm, tk) <= budget:
                tm_sel, tk_sel = tm, tk
                done = True
                break
        if done:
            break

    total = footprint(tm_sel, tk_sel)
    vmem_limit = max(16 << 20, min(int(0.9 * cap), total + (8 << 20)))
    return tm_sel, tk_sel, vmem_limit


# --------------------------------------------------------------------------
# Pallas kernel: out_rows = Â_rows @ XW + b, K-tiled with f32 accumulator
# --------------------------------------------------------------------------
def _gcn_aggregate_kernel(a_ref, xw_ref, b_ref, o_ref, acc_ref, *, apply_relu):
    # a_ref  : (tm, tk)  bf16 tile of normalized adjacency
    # xw_ref : (tk, F)   bf16 tile of X @ W (precomputed outside)
    # b_ref  : (1, F)    f32 bias
    # o_ref  : (tm, F)   bf16 or f32 output tile
    # acc_ref: (tm, F)   f32 accumulator scratch
    k = pl.program_id(1)

    @pl.when(k == 0)
    def _():
        acc_ref[...] = jnp.zeros_like(acc_ref)

    acc_ref[...] += jnp.dot(
        a_ref[...], xw_ref[...], preferred_element_type=jnp.float32
    )

    @pl.when(k == pl.num_programs(1) - 1)
    def _():
        out = acc_ref[...] + b_ref[...]
        if apply_relu:
            out = jnp.maximum(out, 0.0)
        o_ref[...] = out.astype(o_ref.dtype)


def gcn_aggregate(a_p, xw_p, b_p, *, tm, tk, vmem_limit, apply_relu, out_dtype):
    """out = Â @ XW + b (optionally relu), row-tiled x K-tiled on the MXU."""
    n_pad, k_pad = a_p.shape
    f_pad = xw_p.shape[1]
    assert n_pad % tm == 0 and k_pad % tk == 0

    kernel = functools.partial(_gcn_aggregate_kernel, apply_relu=apply_relu)
    return pl.pallas_call(
        kernel,
        out_shape=jax.ShapeDtypeStruct((n_pad, f_pad), out_dtype),
        grid_spec=pltpu.PrefetchScalarGridSpec(
            num_scalar_prefetch=0,
            grid=(n_pad // tm, k_pad // tk),
            in_specs=[
                pl.BlockSpec((tm, tk), lambda i, k: (i, k)),      # Â tile
                pl.BlockSpec((tk, f_pad), lambda i, k: (k, 0)),   # XW tile
                pl.BlockSpec((1, f_pad), lambda i, k: (0, 0)),    # bias
            ],
            out_specs=pl.BlockSpec((tm, f_pad), lambda i, k: (i, 0)),
            scratch_shapes=[pltpu.VMEM((tm, f_pad), jnp.float32)],
        ),
        compiler_params=pltpu.CompilerParams(
            dimension_semantics=("parallel", "arbitrary"),
            vmem_limit_bytes=vmem_limit,
        ),
    )(a_p, xw_p, b_p)


# --------------------------------------------------------------------------
# Glue: dense normalized adjacency Â = D^-1/2 (A + I) D^-1/2
# --------------------------------------------------------------------------
def normalized_adjacency(edge_index, num_nodes):
    src = edge_index[0]
    dst = edge_index[1]
    # Duplicate edges accumulate (scatter-add), matching PyG's message sum.
    # Existing self-loops are dropped and replaced by the unit diagonal
    # (add_remaining_self_loops semantics) so they are never double-counted.
    not_self = (src != dst).astype(jnp.float32)
    a = jnp.zeros((num_nodes, num_nodes), dtype=jnp.float32)
    a = a.at[dst, src].add(not_self)                # message flows src -> dst
    a = a + jnp.eye(num_nodes, dtype=jnp.float32)   # self loops
    deg = jnp.sum(a, axis=1)
    d_inv_sqrt = jnp.where(deg > 0, 1.0 / jnp.sqrt(deg), 0.0)
    return a * d_inv_sqrt[:, None] * d_inv_sqrt[None, :]


# --------------------------------------------------------------------------
# Full GCN forward (eval mode: dropout with p=0.5 is identity at inference)
# --------------------------------------------------------------------------
def gcn_forward(x, edge_index, params):
    n, fin = x.shape
    hid = params["w1"].shape[1]
    fout = params["w2"].shape[1]

    fin_pad = _round_up(fin, LANE)
    hid_pad = _round_up(hid, LANE)
    fout_pad = _round_up(fout, LANE)
    f_max = max(hid_pad, fout_pad)

    # Choose tiles once (worst-case f32 output), then pad N to a tile multiple.
    tm, tk, vmem_limit = _choose_tiles(n, f_max, 4)
    n_pad = _round_up(n, max(tm, tk))

    a = normalized_adjacency(edge_index, n)
    a_p = _pad2d(a, n_pad, n_pad).astype(jnp.bfloat16)
    x_p = _pad2d(x, n_pad, fin_pad).astype(jnp.float32)
    w1_p = _pad2d(params["w1"], fin_pad, hid_pad).astype(jnp.float32)
    b1_p = jnp.pad(params["b1"], (0, hid_pad - hid)).reshape(1, hid_pad).astype(jnp.float32)
    w2_p = _pad2d(params["w2"], hid_pad, fout_pad).astype(jnp.float32)
    b2_p = jnp.pad(params["b2"], (0, fout_pad - fout)).reshape(1, fout_pad).astype(jnp.float32)

    # Layer 1: hoist the tiny X @ W1 to XLA, stream the narrow product through Â.
    xw1 = jnp.dot(x_p, w1_p, preferred_element_type=jnp.float32).astype(jnp.bfloat16)
    h_p = gcn_aggregate(a_p, xw1, b1_p, tm=tm, tk=tk, vmem_limit=vmem_limit,
                        apply_relu=True, out_dtype=jnp.bfloat16)

    # Layer 2: same shape of work, no relu, f32 final output.
    hw2 = jnp.dot(h_p, w2_p, preferred_element_type=jnp.float32).astype(jnp.bfloat16)
    out_p = gcn_aggregate(a_p, hw2, b2_p, tm=tm, tk=tk, vmem_limit=vmem_limit,
                          apply_relu=False, out_dtype=jnp.float32)

    return out_p[:n, :fout]


# --------------------------------------------------------------------------
# Params + pure-JAX reference
# --------------------------------------------------------------------------
def init_params(key, in_channels, hidden_channels, out_channels):
    k1, k2 = jax.random.split(key)

    def glorot(k, fan_in, fan_out):
        limit = jnp.sqrt(6.0 / (fan_in + fan_out))
        return jax.random.uniform(k, (fan_in, fan_out), jnp.float32, -limit, limit)

    return {
        "w1": glorot(k1, in_channels, hidden_channels),
        "b1": jnp.zeros((hidden_channels,), jnp.float32),
        "w2": glorot(k2, hidden_channels, out_channels),
        "b2": jnp.zeros((out_channels,), jnp.float32),
    }


def gcn_reference(x, edge_index, params):
    a = normalized_adjacency(edge_index, x.shape[0])
    h = jnp.maximum(a @ (x @ params["w1"]) + params["b1"], 0.0)
    return a @ (h @ params["w2"]) + params["b2"]


if __name__ == "__main__":
    key = jax.random.PRNGKey(0)
    k_x, k_e, k_p = jax.random.split(key, 3)

    num_nodes = 16
    in_channels, hidden_channels, out_channels = 4, 32, 7
    num_edges = 24

    # Node features [N, Fin]
    x = jax.random.normal(k_x, (num_nodes, in_channels), dtype=jnp.float32)

    # Random undirected edge list (both directions), shape [2, 2*E]
    src = jax.random.randint(k_e, (num_edges,), 0, num_nodes)
    dst = jax.random.randint(jax.random.fold_in(k_e, 1), (num_edges,), 0, num_nodes)
    edge_index = jnp.stack(
        [jnp.concatenate([src, dst]), jnp.concatenate([dst, src])], axis=0
    ).astype(jnp.int32)

    params = init_params(k_p, in_channels, hidden_channels, out_channels)

    out = gcn_forward(x, edge_index, params)
    out = jax.block_until_ready(out)

    assert out.shape == (num_nodes, out_channels)
    assert jnp.all(jnp.isfinite(out))

    # Loose tolerance: Â / feature streams are bf16 inside the kernels.
    ref = gcn_reference(x, edge_index, params)
    assert jnp.allclose(out, ref, atol=5e-2, rtol=5e-2), (
        float(jnp.max(jnp.abs(out - ref)))
    )

    print("KERNEL_OK")
</pallas_src>

<mosaic_0001>
module attributes {stable_mosaic.version = 11 : i64} {
  func.func @_gcn_aggregate_kernel(%arg0: i32, %arg1: i32, %arg2: memref<128x128xbf16, #tpu.memory_space<vmem>>, %arg3: memref<128x128xbf16, #tpu.memory_space<vmem>>, %arg4: memref<1x128xf32, #tpu.memory_space<vmem>>, %arg5: memref<128x128xbf16, #tpu.memory_space<vmem>>, %arg6: memref<128x128xf32, #tpu.memory_space<vmem>>) attributes {dimension_semantics = [#tpu.dimension_semantics<parallel>, #tpu.dimension_semantics<arbitrary>], iteration_bounds = array<i64: 1, 1>, scalar_prefetch = 0 : i64, scratch_operands = 1 : i64, tpu.core_type = #tpu.core_type<tc>, window_params = [{transform_indices = @transform_0, window_bounds = array<i64: 128, 128>}, {transform_indices = @transform_1, window_bounds = array<i64: 128, 128>}, {pipeline_mode = #tpu.pipeline_mode<synchronous>, transform_indices = @transform_2, window_bounds = array<i64: 1, 128>}, {transform_indices = @transform_3, window_bounds = array<i64: 128, 128>}]} {
    %c0_i32 = arith.constant 0 : i32
    %0 = arith.cmpi eq, %arg1, %c0_i32 : i32
    %1 = arith.extui %0 : i1 to i32
    %c0_i32_0 = arith.constant 0 : i32
    %2 = arith.cmpi ne, %1, %c0_i32_0 : i32
    scf.if %2 {
      %cst_10 = arith.constant 0.000000e+00 : f32
      %12 = vector.broadcast %cst_10 : f32 to vector<128x128xf32>
      %c0_11 = arith.constant 0 : index
      %c0_12 = arith.constant 0 : index
      %13 = vector.load %arg6[%c0_11, %c0_12] : memref<128x128xf32, #tpu.memory_space<vmem>>, vector<128x128xf32>
      tpu.vector_store %arg6[%c0_11, %c0_12], %12 {strides = array<i32>} : memref<128x128xf32, #tpu.memory_space<vmem>>, vector<128x128xf32>,
    } else {
    }
    %c0 = arith.constant 0 : index
    %c0_1 = arith.constant 0 : index
    %3 = vector.load %arg6[%c0, %c0_1] : memref<128x128xf32, #tpu.memory_space<vmem>>, vector<128x128xf32>
    %c0_2 = arith.constant 0 : index
    %c0_3 = arith.constant 0 : index
    %4 = vector.load %arg2[%c0_2, %c0_3] : memref<128x128xbf16, #tpu.memory_space<vmem>>, vector<128x128xbf16>
    %c0_4 = arith.constant 0 : index
    %c0_5 = arith.constant 0 : index
    %5 = vector.load %arg3[%c0_4, %c0_5] : memref<128x128xbf16, #tpu.memory_space<vmem>>, vector<128x128xbf16>
    %cst = arith.constant dense<0.000000e+00> : vector<128x128xf32>
    %6 = tpu.matmul %4, %5, %cst {dimension_numbers = #tpu.dot_dimension_numbers<[1], [0], [0], [1], [0, 0, 1, 1], [], []>} : vector<128x128xbf16>, vector<128x128xbf16>, vector<128x128xf32> -> vector<128x128xf32>
    %7 = arith.addf %3, %6 : vector<128x128xf32>
    %c0_6 = arith.constant 0 : index
    %c0_7 = arith.constant 0 : index
    %8 = vector.load %arg6[%c0_6, %c0_7] : memref<128x128xf32, #tpu.memory_space<vmem>>, vector<128x128xf32>
    tpu.vector_store %arg6[%c0_6, %c0_7], %7 {strides = array<i32>} : memref<128x128xf32, #tpu.memory_space<vmem>>, vector<128x128xf32>,
    %c0_i32_8 = arith.constant 0 : i32
    %9 = arith.cmpi eq, %arg1, %c0_i32_8 : i32
    %10 = arith.extui %9 : i1 to i32
    %c0_i32_9 = arith.constant 0 : i32
    %11 = arith.cmpi ne, %10, %c0_i32_9 : i32
    scf.if %11 {
      %c0_10 = arith.constant 0 : index
      %c0_11 = arith.constant 0 : index
      %12 = vector.load %arg6[%c0_10, %c0_11] : memref<128x128xf32, #tpu.memory_space<vmem>>, vector<128x128xf32>
      %c0_12 = arith.constant 0 : index
      %c0_13 = arith.constant 0 : index
      %13 = vector.load %arg4[%c0_12, %c0_13] : memref<1x128xf32, #tpu.memory_space<vmem>>, vector<1x128xf32>
      %14 = vector.broadcast %13 : vector<1x128xf32> to vector<128x128xf32>
      %15 = arith.addf %12, %14 : vector<128x128xf32>
      %cst_14 = arith.constant 0.000000e+00 : f32
      %16 = vector.broadcast %cst_14 : f32 to vector<128x128xf32>
      %17 = arith.maximumf %15, %16 : vector<128x128xf32>
      %18 = arith.truncf %17 : vector<128x128xf32> to vector<128x128xbf16>
      %c0_15 = arith.constant 0 : index
      %c0_16 = arith.constant 0 : index
      %19 = vector.load %arg5[%c0_15, %c0_16] : memref<128x128xbf16, #tpu.memory_space<vmem>>, vector<128x128xbf16>
      tpu.vector_store %arg5[%c0_15, %c0_16], %18 {strides = array<i32>} : memref<128x128xbf16, #tpu.memory_space<vmem>>, vector<128x128xbf16>,
    } else {
    }
    return
  }
  func.func @transform_0(%arg0: i32, %arg1: i32) -> (i32, i32) {
    %c0_i32 = arith.constant 0 : i32
    return %arg0, %arg1 : i32, i32
  }
  func.func @transform_1(%arg0: i32, %arg1: i32) -> (i32, i32) {
    %c0_i32 = arith.constant 0 : i32
    %c0_i32_0 = arith.constant 0 : i32
    return %arg1, %c0_i32 : i32, i32
  }
  func.func @transform_2(%arg0: i32, %arg1: i32) -> (i32, i32) {
    %c0_i32 = arith.constant 0 : i32
    %c0_i32_0 = arith.constant 0 : i32
    %c0_i32_1 = arith.constant 0 : i32
    return %c0_i32, %c0_i32_0 : i32, i32
  }
  func.func @transform_3(%arg0: i32, %arg1: i32) -> (i32, i32) {
    %c0_i32 = arith.constant 0 : i32
    %c0_i32_0 = arith.constant 0 : i32
    return %arg0, %c0_i32 : i32, i32
  }
}

</mosaic_0001>

<bundles_post_ra>
// kernel: tpu_custom_call.1
= control target key start
LH: loop header
LB: loop body
LE: loop exit
PB: predicated region body
PF: predicated region fallthrough
CT: control target
= control target key end

     0   :  { %8 = vsyncpa [#allocation4], 0  ;;  %s819_s0 = inlined_call_operand.hbm [shape: bf16[128,128], index: 0, kind: input, shape index: {}]   ;;  %s820_s1 = inlined_call_operand.hbm [shape: bf16[128,128], index: 1, kind: input, shape index: {}]   ;;  %s821_s2 = inlined_call_operand.vmem [shape: f32[1,128], index: 2, kind: input, shape index: {}]   ;;  %s822_s3 = inlined_call_operand.hbm [shape: bf16[128,128], index: 3, kind: output, shape index: {}]  }
   0x1   :  { %9 = vsyncpa [#allocation7], 0 }
   0x2   :  { %10 = vsyncpa [#allocation5], 0  ;;  %s746_s12 = smov [#allocation3]   ;;  %s674_s16 = scalar_lea.hbm %s819_s0, 1024 }
   0x3   :  { %s16_s13 = sshll.u32 %s746_s12, 4  ;;  %p675_p0 = scmp.ne.s32.totalorder %s819_s0, %s674_s16  ;;  %s17_s13 = int_to_ptr.vmem [resolvable:$true] %s16_s13 }
   0x4   :  { %p678_p1 = scmp.lt.u32.totalorder %s674_s16, %s819_s0 }
   0x6   :  { %p680_p2 = pnand %p678_p1, %p675_p0 }
   0x8   :  { %683 = shalt.err (!%p680_p2)
}
   0x9   :  { %s684_s21 = scalar_lea.vmem %s17_s13, 1024  ;;  %p689_p4 = scmp.lt.s32.totalorder %s17_s13, %s17_s13 }
   0xa   :  { %p685_p3 = scmp.ne.s32.totalorder %s17_s13, %s684_s21  ;;  %p690_p5 = scmp.lt.s32.totalorder %s684_s21, %s684_s21 }
   0xc   :  { %p691_p6 = por %p690_p5, %p689_p4 }
   0xe   :  { %p692_p7 = pnand %p691_p6, %p685_p3 }
  0x10   :  { %695 = shalt.err (!%p692_p7)
}
  0x11   :  { %s747_s22 = smov 64   ;;  %s748_s23 = smov 4  }
  0x12   :  { %22 = dma.hbm_to_vmem [thread:$0]  %s819_s0, 1024, %s17_s13, [#allocation4], %s747_s22, %s747_s22, %s748_s23  }
  0x13   :  { %s749_s26 = smov [#allocation6]   ;;  %s696_s30 = scalar_lea.hbm %s820_s1, 1024 }
  0x14   :  { %s28_s27 = sshll.u32 %s749_s26, 4  ;;  %p697_p8 = scmp.ne.s32.totalorder %s820_s1, %s696_s30  ;;  %s29_s27 = int_to_ptr.vmem [resolvable:$true] %s28_s27 }
  0x15   :  { %p700_p9 = scmp.lt.u32.totalorder %s696_s30, %s820_s1 }
  0x17   :  { %p702_p10 = pnand %p700_p9, %p697_p8 }
  0x19   :  { %705 = shalt.err (!%p702_p10)
}
  0x1a   :  { %s706_s8 = scalar_lea.vmem %s29_s27, 1024  ;;  %p711_p12 = scmp.lt.s32.totalorder %s29_s27, %s29_s27 }
  0x1b   :  { %p707_p11 = scmp.ne.s32.totalorder %s29_s27, %s706_s8  ;;  %p712_p13 = scmp.lt.s32.totalorder %s706_s8, %s706_s8 }
  0x1d   :  { %p713_p0 = por %p712_p13, %p711_p12 }
  0x1f   :  { %p714_p1 = pnand %p713_p0, %p707_p11 }
  0x21   :  { %717 = shalt.err (!%p714_p1)
}
  0x22   :  { %34 = dma.hbm_to_vmem [thread:$0]  %s820_s1, 1024, %s29_s27, [#allocation7], %s747_s22, %s747_s22, %s748_s23  }
  0x23   :  { %740 = dma.done.wait [#allocation4], 1024  }
  0x24   :  { %741 = vsyncadd [#allocation4], 4294966272 }
  0x25   :  { %742 = dma.done.wait [#allocation7], 1024  }
  0x26   :  { %743 = vsyncadd [#allocation7], 4294966272  ;;  %v658_v0 = vld [vmem:[#allocation6] sm:$0xff]   ;;  %v659_v1 = vld [vmem:[#allocation6 + $0x8] sm:$0xff]  }
  0x27   :  { %605 = vmatprep.subr.bf16.mxu0 %v658_v0  ;;  %637 = vmatprep.subr.bf16.mxu1 %v658_v0  ;;  %v660_v2 = vld [vmem:[#allocation6 + $0x10] sm:$0xff]   ;;  %v661_v3 = vld [vmem:[#allocation6 + $0x18] sm:$0xff]   ;;  %v666_v4 = vld [vmem:[#allocation3] sm:$0xff]  }
  0x28   :  { %606 = vmatpush3.bf16.msra.mxu0 %v658_v0  ;;  %645 = vmatpush3.bf16.msra.mxu1 %v658_v0  ;;  %v667_v5 = vld [vmem:[#allocation3 + $0x20] sm:$0xff]   ;;  %v663_v7 = vld [vmem:[#allocation6 + $0x28] sm:$0xff]   ;;  %v664_v8 = vld [vmem:[#allocation6 + $0x30] sm:$0xff]  }
  0x29   :  { %607 = vmatprep.subr.bf16.mxu0 %v659_v1  ;;  %638 = vmatprep.subr.bf16.mxu1 %v659_v1  ;;  %v662_v6 = vld [vmem:[#allocation6 + $0x20] sm:$0xff]   ;;  %v665_v9 = vld [vmem:[#allocation6 + $0x38] sm:$0xff]   ;;  %v668_v10 = vld [vmem:[#allocation3 + $0x8] sm:$0xff]  }
  0x2a   :  { %621 = vmatprep.mubr.bf16.mxu0 %v666_v4  ;;  %629 = vmatprep.mubr.bf16.mxu1 %v667_v5  ;;  %v669_v11 = vld [vmem:[#allocation3 + $0x28] sm:$0xff]   ;;  %v670_v12 = vld [vmem:[#allocation3 + $0x10] sm:$0xff]   ;;  %v672_v14 = vld [vmem:[#allocation3 + $0x18] sm:$0xff]  }
  0x2b   :  { %v671_v13 = vld [vmem:[#allocation3 + $0x30] sm:$0xff]   ;;  %v673_v15 = vld [vmem:[#allocation3 + $0x38] sm:$0xff]   ;;  %v509_v16 = vld [vmem:[%s821_s2] ss:$0 sm:$0xff]  ;;  %s750_s2 = smov [#allocation8]  }
  0x2c   :  { %608 = vmatpush3.bf16.msra.mxu0 %v659_v1  ;;  %646 = vmatpush3.bf16.msra.mxu1 %v659_v1  ;;  %s480_s11 = sshll.u32 %s750_s2, 4  ;;  %s481_s11 = int_to_ptr.vmem [resolvable:$true] %s480_s11 }
  0x2d   :  { %609 = vmatprep.subr.bf16.mxu0 %v660_v2  ;;  %639 = vmatprep.subr.bf16.mxu1 %v660_v2  ;;  %s718_s12 = scalar_lea.vmem %s481_s11, 1024  ;;  %p723_p3 = scmp.lt.s32.totalorder %s481_s11, %s481_s11 }
  0x2e   :  { %p719_p2 = scmp.ne.s32.totalorder %s481_s11, %s718_s12  ;;  %p724_p4 = scmp.lt.s32.totalorder %s718_s12, %s718_s12 }
  0x30   :  { %610 = vmatpush3.bf16.msra.mxu0 %v660_v2  ;;  %647 = vmatpush3.bf16.msra.mxu1 %v660_v2  ;;  %p725_p5 = por %p724_p4, %p723_p3 }
  0x31   :  { %611 = vmatprep.subr.bf16.mxu0 %v661_v3  ;;  %640 = vmatprep.subr.bf16.mxu1 %v661_v3 }
  0x32   :  { %p726_p6 = pnand %p725_p5, %p719_p2 }
  0x34   :  { %612 = vmatpush3.bf16.msra.mxu0 %v661_v3  ;;  %648 = vmatpush3.bf16.msra.mxu1 %v661_v3 }
  0x35   :  { %613 = vmatprep.subr.bf16.mxu0 %v662_v6  ;;  %641 = vmatprep.subr.bf16.mxu1 %v662_v6 }
  0x38   :  { %614 = vmatpush3.bf16.msra.mxu0 %v662_v6  ;;  %649 = vmatpush3.bf16.msra.mxu1 %v662_v6 }
  0x39   :  { %615 = vmatprep.subr.bf16.mxu0 %v663_v7  ;;  %642 = vmatprep.subr.bf16.mxu1 %v663_v7 }
  0x3c   :  { %616 = vmatpush3.bf16.msra.mxu0 %v663_v7  ;;  %650 = vmatpush3.bf16.msra.mxu1 %v663_v7 }
  0x3d   :  { %617 = vmatprep.subr.bf16.mxu0 %v664_v8  ;;  %643 = vmatprep.subr.bf16.mxu1 %v664_v8 }
  0x40   :  { %618 = vmatpush3.bf16.msra.mxu0 %v664_v8  ;;  %651 = vmatpush3.bf16.msra.mxu1 %v664_v8 }
  0x41   :  { %619 = vmatprep.subr.bf16.mxu0 %v665_v9  ;;  %644 = vmatprep.subr.bf16.mxu1 %v665_v9 }
  0x44   :  { %620 = vmatpush3.bf16.msra.mxu0 %v665_v9  ;;  %652 = vmatpush3.bf16.msra.mxu1 %v665_v9 }
  0x47   :  { %622 = vmatmul.mubr.bf16.vlgmr.msra.gmra.mrb[0].mxu0 %v668_v10  ;;  %630 = vmatmul.mubr.bf16.vlgmr.msra.gmra.mrb[0].mxu1 %v669_v11 }
  0x48   :  { %625 = vmatprep.mubr.bf16.mxu0 %v670_v12  ;;  %633 = vmatprep.mubr.bf16.mxu1 %v671_v13 }
  0x4f   :  { %626 = vmatmul.mubr.bf16.gmra.mrb[4].mxu0 %v672_v14  ;;  %634 = vmatmul.mubr.bf16.gmra.mrb[4].mxu1 %v673_v15 }
 0x11a   :  { %v623_v17 = vpop.f32.mrb[0].mxu0  ;;  %v631_v18 = vpop.f32.mrb[0].mxu1 }
 0x11b   :  { %v365_v19 = vadd.f32 %v623_v17, %v509_v16  ;;  %v373_v20 = vadd.f32 %v631_v18, %v509_v16  ;;  %v242_v21 = vpop.f32.mrb[1].mxu0  ;;  %v274_v22 = vpop.f32.mrb[1].mxu1 }
 0x11c   :  { %v363_v23 = vadd.f32 %v509_v16, %v242_v21  ;;  %v371_v24 = vadd.f32 %v509_v16, %v274_v22  ;;  %v624_v25 = vpop.f32.mrb[2].mxu0  ;;  %v632_v26 = vpop.f32.mrb[2].mxu1 }
 0x11d   :  { %v366_v27 = vadd.f32 %v624_v25, %v509_v16  ;;  %v374_v28 = vadd.f32 %v632_v26, %v509_v16  ;;  %v245_v29 = vpop.f32.mrb[3].mxu0  ;;  %v277_v30 = vpop.f32.mrb[3].mxu1  ;;  %v381_v33 = vmax.f32 %v365_v19, 0.0  ;;  %v389_v34 = vmax.f32 %v373_v20, 0.0 }
 0x11e   :  { %v364_v31 = vadd.f32 %v509_v16, %v245_v29  ;;  %v372_v32 = vadd.f32 %v509_v16, %v277_v30  ;;  %v379_v37 = vmax.f32 %v363_v23, 0.0  ;;  %v387_v38 = vmax.f32 %v371_v24, 0.0 }
 0x11f   :  { %v382_v35 = vmax.f32 %v366_v27, 0.0  ;;  %v390_v36 = vmax.f32 %v374_v28, 0.0 }
 0x120   :  { %v380_v39 = vmax.f32 %v364_v31, 0.0  ;;  %v388_v40 = vmax.f32 %v372_v32, 0.0 }
 0x121   :  { %v550_v41 = vpack.c.bf16 %v382_v35, %v381_v33  ;;  %v570_v42 = vpack.c.bf16 %v390_v36, %v389_v34 }
 0x122   :  { %v545_v43 = vpack.c.bf16 %v380_v39, %v379_v37  ;;  %v565_v44 = vpack.c.bf16 %v388_v40, %v387_v38  ;;  %v627_v45 = vpop.f32.mrb[4].mxu0  ;;  %v635_v46 = vpop.f32.mrb[4].mxu1 }
 0x123   :  { %582 = vst [vmem:[#allocation8 + $0x8] sm:$0xff] %v550_v41   ;;  %586 = vst [vmem:[#allocation8 + $0x28] sm:$0xff] %v570_v42   ;;  %v369_v47 = vadd.f32 %v627_v45, %v509_v16  ;;  %v377_v48 = vadd.f32 %v635_v46, %v509_v16  ;;  %v258_v49 = vpop.f32.mrb[5].mxu0  ;;  %v290_v50 = vpop.f32.mrb[5].mxu1 }
 0x124   :  { %546 = vst [vmem:[#allocation8] sm:$0xff] %v545_v43   ;;  %585 = vst [vmem:[#allocation8 + $0x20] sm:$0xff] %v565_v44   ;;  %v367_v51 = vadd.f32 %v509_v16, %v258_v49  ;;  %v375_v52 = vadd.f32 %v509_v16, %v290_v50  ;;  %v628_v53 = vpop.f32.mrb[6].mxu0  ;;  %v636_v54 = vpop.f32.mrb[6].mxu1 }
 0x125   :  { %v370_v55 = vadd.f32 %v628_v53, %v509_v16  ;;  %v378_v56 = vadd.f32 %v636_v54, %v509_v16  ;;  %v261_v57 = vpop.f32.mrb[7].mxu0  ;;  %v293_v58 = vpop.f32.mrb[7].mxu1  ;;  %v385_v61 = vmax.f32 %v369_v47, 0.0  ;;  %v393_v62 = vmax.f32 %v377_v48, 0.0 }
 0x126   :  { %v368_v59 = vadd.f32 %v509_v16, %v261_v57  ;;  %v376_v60 = vadd.f32 %v509_v16, %v293_v58  ;;  %v383_v1 = vmax.f32 %v367_v51, 0.0  ;;  %v391_v2 = vmax.f32 %v375_v52, 0.0 }
 0x127   :  { %v386_v63 = vmax.f32 %v370_v55, 0.0  ;;  %v394_v0 = vmax.f32 %v378_v56, 0.0 }
 0x128   :  { %v384_v3 = vmax.f32 %v368_v59, 0.0  ;;  %v392_v4 = vmax.f32 %v376_v60, 0.0 }
 0x129   :  { %v560_v5 = vpack.c.bf16 %v386_v63, %v385_v61  ;;  %v580_v6 = vpack.c.bf16 %v394_v0, %v393_v62 }
 0x12a   :  { %v555_v7 = vpack.c.bf16 %v384_v3, %v383_v1  ;;  %v575_v8 = vpack.c.bf16 %v392_v4, %v391_v2 }
 0x12b   :  { %584 = vst [vmem:[#allocation8 + $0x18] sm:$0xff] %v560_v5   ;;  %588 = vst [vmem:[#allocation8 + $0x38] sm:$0xff] %v580_v6  }
 0x12c   :  { %583 = vst [vmem:[#allocation8 + $0x10] sm:$0xff] %v555_v7   ;;  %587 = vst [vmem:[#allocation8 + $0x30] sm:$0xff] %v575_v8  }
 0x12d   :  { %729 = shalt.err (!%p726_p6)
}
 0x12e   :  { %s730_s15 = scalar_lea.hbm %s822_s3, 1024 }
 0x12f   :  { %p731_p7 = scmp.ne.s32.totalorder %s822_s3, %s730_s15  ;;  %p734_p8 = scmp.lt.u32.totalorder %s730_s15, %s822_s3 }
 0x131   :  { %p736_p9 = pnand %p734_p8, %p731_p7 }
 0x133   :  { %739 = shalt.err (!%p736_p9)
}
 0x134   :  { %486 = dma.vmem_to_hbm [thread:$0]  %s481_s11, 1024, %s822_s3, [#allocation5], %s747_s22, %s747_s22, %s748_s23  }
 0x135   :  { %744 = dma.done.wait [#allocation5], 1024  }
 0x136   :  { %745 = vsyncadd [#allocation5], 4294966272 }
 0x137   :  { %490 = vsyncpa [#allocation4], 1 }
 0x138   :  { %491 = vsyncpa [#allocation7], 1 }
 0x139   :  { %492 = vsyncpa [#allocation5], 1 }

</bundles_post_ra>
